<compile_context>
chip_gen: v7x
topology: tpu7x:2x2x1
jax: 0.10.0
libtpu: 0.0.40
codegen_flags: <defaults>
</compile_context>

<pallas_src>
import functools

import jax
import jax.numpy as jnp
from jax.experimental import pallas as pl
from jax.experimental.pallas import tpu as pltpu

NEG_BIG = -1e30  # python float (NOT a jnp array -> avoids captured-constant error)


# ----------------------------- kernels --------------------------------------

def _sigmoid_kernel(x_ref, o_ref):
    x = x_ref[...].astype(jnp.float32)
    # sigmoid(x) = 1 / (1 + exp(-x)); exp on EUP, exact reciprocal (test tol 1e-5)
    o_ref[...] = pl.reciprocal(1.0 + jnp.exp(-x)).astype(o_ref.dtype)


def _dtopk_kernel(x_ref, o_ref, *, k, temperature):
    """differentiable_topk over a (tile_rows, D) block.

    Softmax is shift-invariant, so exp(x/T - m0) is computed once with the
    iteration-0 row max m0.  Each of the k iterations then only needs:
      e_top = max(e)          (top softmax numerator among remaining cols)
      val   = e_top / denom   (== softmax value at that column)
      scatter val at the (first) argmax column, zero that column of e,
      denom -= e_top.
    This is mathematically identical to recomputing softmax(x_masked / T) each
    iteration (as the PyTorch reference does).
    """
    x = x_ref[...].astype(jnp.float32)
    n, D = x.shape
    inv_t = 1.0 / float(temperature)            # python float -> no captured const
    col = jax.lax.broadcasted_iota(jnp.int32, (n, D), 1)

    scaled = x * inv_t
    m0 = jnp.max(scaled, axis=-1, keepdims=True)          # (n, 1)
    e0 = jnp.exp(scaled - m0)                              # single EUP pass
    denom0 = jnp.sum(e0, axis=-1, keepdims=True)           # single sum reduce
    out0 = jnp.zeros((n, D), jnp.float32)

    def body(_, carry):
        e, out, denom = carry
        e_top = jnp.max(e, axis=-1, keepdims=True)                      # (n, 1)
        # first index attaining the max (matches torch.topk(1) tie-break)
        idx = jnp.min(jnp.where(e == e_top, col, D), axis=-1, keepdims=True)
        onehot = col == idx
        val = e_top / denom                                             # softmax top value
        out = out + jnp.where(onehot, val, 0.0)                         # scatter_
        e = jnp.where(onehot, 0.0, e)                                   # remove column
        denom = denom - e_top                                           # running denominator
        return e, out, denom

    _, out, _ = jax.lax.fori_loop(0, k, body, (e0, out0, denom0), unroll=True)
    o_ref[...] = out.astype(o_ref.dtype)


# ----------------------------- wrappers -------------------------------------

def _row_tiled_call(kernel, x, out_dtype, tile_rows=8):
    """Tile the row (sublane) dimension; keep the full lane dim per block."""
    n, d = x.shape
    if n % tile_rows != 0:
        tile_rows = n                       # fall back to a single full block
    grid = (n // tile_rows,)
    return pl.pallas_call(
        kernel,
        out_shape=jax.ShapeDtypeStruct((n, d), out_dtype),
        grid=grid,
        in_specs=[pl.BlockSpec((tile_rows, d), lambda i: (i, 0))],
        out_specs=pl.BlockSpec((tile_rows, d), lambda i: (i, 0)),
        compiler_params=pltpu.CompilerParams(dimension_semantics=("parallel",)),
    )(x)


def pallas_sigmoid(cls):
    return _row_tiled_call(_sigmoid_kernel, cls.astype(jnp.float32), jnp.float32)


def pallas_differentiable_topk(cls, k, temperature):
    kern = functools.partial(_dtopk_kernel, k=int(k), temperature=float(temperature))
    return _row_tiled_call(kern, cls.astype(jnp.float32), jnp.float32)


class LatentsPallas:
    """JAX/Pallas port of big_sleep.Latents (forward only)."""

    def __init__(self, num_latents=32, max_classes=None, class_temperature=2.0,
                 key=jax.random.PRNGKey(0)):
        assert max_classes is None or (0 < max_classes <= 1000)
        k1, k2 = jax.random.split(key)
        # torch: zeros(num_latents,128).normal_(std=1)
        self.normu = jax.random.normal(k1, (num_latents, 128), jnp.float32)
        # torch: zeros(num_latents,1000).normal_(mean=-3.9, std=0.3)
        self.cls = -3.9 + 0.3 * jax.random.normal(k2, (num_latents, 1000), jnp.float32)
        self.thresh_lat = jnp.array(1)  # registered buffer, unused in forward
        self.max_classes = max_classes
        self.class_temperature = class_temperature

    def forward(self):
        if self.max_classes is not None:
            classes = pallas_differentiable_topk(
                self.cls, self.max_classes, self.class_temperature)
        else:
            classes = pallas_sigmoid(self.cls)
        return self.normu, classes


# ----------------------------- reference (pure JAX) --------------------------

def _ref_differentiable_topk(x, k, temperature):
    n, dim = x.shape
    out = jnp.zeros_like(x)
    for _ in range(k):
        sm = jax.nn.softmax(x / temperature, axis=-1)
        idx = jnp.argmax(sm, axis=-1)
        val = jnp.max(sm, axis=-1)
        onehot = jax.nn.one_hot(idx, dim, dtype=x.dtype)
        out = out + onehot * val[:, None]
        x = jnp.where(onehot > 0, NEG_BIG, x)
    return out


# ----------------------------- main ------------------------------------------

if __name__ == "__main__":
    key = jax.random.PRNGKey(0)

    # Path 1: max_classes=None -> sigmoid
    lat = LatentsPallas(num_latents=32, max_classes=None, key=key)
    normu, classes = lat.forward()
    jax.block_until_ready((normu, classes))
    assert normu.shape == (32, 128) and classes.shape == (32, 1000)
    ref = jax.nn.sigmoid(lat.cls)
    assert jnp.allclose(classes, ref, atol=1e-5, rtol=1e-5)

    # Path 2: max_classes=15 -> differentiable_topk with temperature 2.0
    lat2 = LatentsPallas(num_latents=32, max_classes=15, class_temperature=2.0, key=key)
    normu2, classes2 = lat2.forward()
    jax.block_until_ready((normu2, classes2))
    assert classes2.shape == (32, 1000)
    ref2 = _ref_differentiable_topk(lat2.cls, 15, 2.0)
    assert jnp.allclose(classes2, ref2, atol=1e-5, rtol=1e-5)

    print("KERNEL_OK")
</pallas_src>

<mosaic_0001>
module attributes {stable_mosaic.version = 11 : i64} {
  func.func @_sigmoid_kernel(%arg0: i32, %arg1: memref<8x1000xf32, #tpu.memory_space<vmem>>, %arg2: memref<8x1000xf32, #tpu.memory_space<vmem>>) attributes {dimension_semantics = [#tpu.dimension_semantics<parallel>], iteration_bounds = array<i64: 4>, scalar_prefetch = 0 : i64, scratch_operands = 0 : i64, tpu.core_type = #tpu.core_type<tc>, window_params = [{transform_indices = @transform_0, window_bounds = array<i64: 8, 1000>}, {transform_indices = @transform_1, window_bounds = array<i64: 8, 1000>}]} {
    %c0 = arith.constant 0 : index
    %c0_0 = arith.constant 0 : index
    %0 = vector.load %arg1[%c0, %c0_0] : memref<8x1000xf32, #tpu.memory_space<vmem>>, vector<8x1000xf32>
    %cst = arith.constant 0.000000e+00 : f32
    %1 = vector.broadcast %cst : f32 to vector<8x1000xf32>
    %2 = arith.subf %1, %0 : vector<8x1000xf32>
    %3 = math.exp %2 : vector<8x1000xf32>
    %cst_1 = arith.constant 1.000000e+00 : f32
    %4 = vector.broadcast %cst_1 : f32 to vector<8x1000xf32>
    %5 = arith.addf %4, %3 : vector<8x1000xf32>
    %6 = tpu.reciprocal %5 : vector<8x1000xf32> -> vector<8x1000xf32>
    %c0_2 = arith.constant 0 : index
    %c0_3 = arith.constant 0 : index
    %7 = vector.load %arg2[%c0_2, %c0_3] : memref<8x1000xf32, #tpu.memory_space<vmem>>, vector<8x1000xf32>
    tpu.vector_store %arg2[%c0_2, %c0_3], %6 {strides = array<i32>} : memref<8x1000xf32, #tpu.memory_space<vmem>>, vector<8x1000xf32>,
    return
  }
  func.func @transform_0(%arg0: i32) -> (i32, i32) {
    %c0_i32 = arith.constant 0 : i32
    %c0_i32_0 = arith.constant 0 : i32
    return %arg0, %c0_i32 : i32, i32
  }
  func.func @transform_1(%arg0: i32) -> (i32, i32) {
    %c0_i32 = arith.constant 0 : i32
    %c0_i32_0 = arith.constant 0 : i32
    return %arg0, %c0_i32 : i32, i32
  }
}

</mosaic_0001>

<bundles_post_ra>
// kernel: tpu_custom_call.1
= control target key start
LH: loop header
LB: loop body
LE: loop exit
PB: predicated region body
PF: predicated region fallthrough
CT: control target
= control target key end

     0   :  { %6 = vsyncpa [#allocation3], 0  ;;  %s642_s0 = inlined_call_operand.hbm [shape: f32[32,1000], index: 0, kind: input, shape index: {}]   ;;  %s643_s1 = inlined_call_operand.hbm [shape: f32[32,1000], index: 1, kind: output, shape index: {}]  }
   0x1   :  { %8 = vsyncpa [#allocation3 + $0x1], 0 }
   0x2   :  { %9 = vsyncpa [#allocation4], 0 }
   0x3   :  { %11 = vsyncpa [#allocation4 + $0x1], 0  ;;  %s479_s6 = smov 0   ;;  %s481_s7 = smov 0  }
   0x4   :  { %s483_s8 = smov 0   ;;  %s485_s9 = smov 0  }
   0x5 LB: > { %s500_s10 = sadd.s32 4294967295, %s465_s9   ;;  %s275_s11 = sadd.s32 4294967294, %s465_s9   ;;  %s465_s9 = sphi %s485_s9, %s657_s9   ;;  %s461_s8 = sphi %s483_s8, %s656_s8   ;;  %s457_s7 = sphi %s481_s7, %s655_s7   ;;  %s453_s6 = sphi %s479_s6, %s654_s6  }
   0x6   : > { %s504_s12 = sadd.s32 1, %s465_s9   ;;  %s24_s13 = sadd.s32 1, %s461_s8 }
   0x7   : > { %s21_s14 = ssub.s32 %s465_s9, %s504_s12  ;;  %p31_p0 = scmp.ne.s32.totalorder %s461_s8, %s457_s7 }
   0x8   : > { %p22_p1 = scmp.eq.s32.totalorder %s21_s14, 0  ;;  %p32_p2 = scmp.eq.s32.totalorder %s465_s9, 0 }
   0x9   : > { %p37_p3 = scmp.ne.s32.totalorder %s457_s7, %s453_s6  ;;  %p38_p4 = scmp.eq.s32.totalorder %s500_s10, 0 }
   0xa   : > { %s516_s15 = scalar_select %p22_p1, %s461_s8, %s24_s13  }
   0xb   : > { %p518_p5 = por %p32_p2, %p31_p0  ;;  %p522_p6 = por %p38_p4, %p37_p3 }
   0xc   : > { %p61_p7 = scmp.eq.s32.totalorder %s500_s10, 3  ;;  %p67_p8 = scmp.eq.s32.totalorder %s275_s11, 3 }
   0xd   : > { %p303_p9 = scmp.lt.s32.totalorder %s465_s9, 4  ;;  %s87_s20 = sand.u32 1, %s461_s8  }
   0xe   : > { %p528_p10 = por %p61_p7, %p31_p0  ;;  %p532_p11 = por %p67_p8, %p37_p3 }
   0xf   : > { %s289_s21 = sshll.u32 %s465_s9, 10  ;;  %s278_s22 = sshll.u32 %s87_s20, 6 }
  0x10   : > { %s647_s18 = scalar_select %p528_p10, 1, 0 }
  0x11   : > { %s648_s19 = scalar_select %p532_p11, 1, 0 }
  0x12   : > { %s541_s25 = scalar_lea.hbm %s642_s0, %s289_s21  ;;  %s91_s26 = scalar_lea.vmem [#allocation2], %s278_s22 }
  0x13   : > { %s99_s27 = sshll.u32 %s91_s26, 4  ;;  %p545_p12 = pnand %p303_p9, %p518_p5  ;;  %s549_s27 = int_to_ptr.vmem [resolvable:$true] %s99_s27 }
  0x14   : > { %s88_s29 = scalar_lea.sflag [#allocation3], %s87_s20  ;;  %s369_s30 = scalar_lea.hbm %s541_s25, 1024 }
  0x15   : > { %p370_p1 = scmp.ne.s32.totalorder %s541_s25, %s369_s30  ;;  %p371_p2 = pneg %p545_p12 }
  0x16   : > { %s374_s4 = scalar_lea.hbm %s642_s0, 4096  ;;  %p375_p5 = scmp.lt.u32.totalorder %s541_s25, %s642_s0 }
  0x17   : > { %p372_p3 = pnand %p371_p2, %p370_p1  ;;  %p376_p7 = scmp.lt.u32.totalorder %s374_s4, %s369_s30 }
  0x18   : > { %p378_p9 = scmp.lt.u32.totalorder %s369_s30, %s541_s25 }
  0x19   : > { %p373_p4 = pneg %p372_p3  ;;  %p377_p8 = por %p376_p7, %p375_p5 }
  0x1b   : > { %p379_p13 = por %p378_p9, %p377_p8 }
  0x1d   : > { %p380_p0 = pnand %p379_p13, %p373_p4 }
  0x1f   : > { %383 = shalt.err (!%p380_p0)
}
  0x20   : > { %s384_s13 = scalar_lea.vmem %s549_s27, 1024  ;;  %s467_s14 = smov [#allocation2]  }
  0x21   : > { %p385_p1 = scmp.ne.s32.totalorder %s549_s27, %s384_s13  ;;  %s389_s16 = sshll.u32 %s467_s14, 4  ;;  %s390_s16 = int_to_ptr.vmem [resolvable:$false] %s389_s16 }
  0x22   : > { %s391_s20 = scalar_lea.vmem %s390_s16, 2048  ;;  %p392_p10 = scmp.lt.s32.totalorder %s549_s27, %s390_s16 }
  0x23   : > { %p387_p3 = pnand %p385_p1, %p371_p2  ;;  %p393_p5 = scmp.lt.s32.totalorder %s391_s20, %s384_s13 }
  0x25   : > { %p388_p11 = pneg %p387_p3  ;;  %p394_p7 = por %p393_p5, %p392_p10 }
  0x27   : > { %p395_p8 = pnand %p394_p7, %p388_p11 }
  0x29   : > { %398 = shalt.err (!%p395_p8)
}
  0x2a   : > { %298 = dma.hbm_to_vmem [thread:$0]  (!%p545_p12), %s541_s25, 1024, %s549_s27, %s88_s29  }
  0x2b   : > { %p650_p13 = scmp.lt.s32.totalorder %s465_s9, 5  ;;  %p651_p0 = scmp.ge.s32.totalorder %s465_s9, 1 }
  0x2d   : > { %p105_p2 = pnand %p651_p0, %p650_p13 }
  0x2e   : > { %s583_s21 = sand.u32 (!%p105_p2), 1, %s457_s7  }
  0x2f   : > { %108 = sbr.rel (%p105_p2) target bundleno = 105 (0x69), region = 24  ;;  %s282_s22 = sshll.u32 (!%p105_p2), %s583_s21, 6 }
  0x30   : > { %s111_s23 = scalar_lea.sflag (!%p105_p2), [#allocation3], %s583_s21  ;;  %s114_s24 = scalar_lea.vmem (!%p105_p2), [#allocation2], %s282_s22 }
  0x36   : > { %444 = dma.done.wait (%p522_p6), %s111_s23, 1024  }
  0x37   : > { %446 = vsyncadd (%p522_p6), %s111_s23, 4294966272  ;;  %v133_v0 = vld [vmem:[%s114_s24] sm:$0xff]  ;;  %v134_v1 = vld [vmem:[%s114_s24 + $0x8] sm:$0xff]  ;;  %s132_s17 = scalar_lea.vmem [#allocation5], %s282_s22  ;;  %s290_s25 = sshll.u32 %s500_s10, 10  ;;  %vm188_vm0 = vcmask 850944  }
  0x38   : > { %v135_v2 = vld [vmem:[%s114_s24 + $0x10] sm:$0xff]  ;;  %v141_v3 = vsub.f32 0.0, %v133_v0  ;;  %v142_v4 = vsub.f32 0.0, %v134_v1  ;;  %v136_v6 = vld [vmem:[%s114_s24 + $0x18] sm:$0xff]  ;;  %v137_v7 = vld [vmem:[%s114_s24 + $0x20] sm:$0xff]  ;;  %s205_s26 = sshll.u32 %s132_s17, 4  ;;  %s599_s29 = scalar_lea.hbm %s643_s1, %s290_s25  ;;  %s601_s26 = int_to_ptr.vmem [resolvable:$true] %s205_s26 }
  0x39   : > { %v143_v5 = vsub.f32 0.0, %v135_v2  ;;  %v138_v8 = vld [vmem:[%s114_s24 + $0x28] sm:$0xff]  ;;  %v144_v9 = vsub.f32 0.0, %v136_v6  ;;  %v145_v10 = vsub.f32 0.0, %v137_v7  ;;  %v139_v12 = vld [vmem:[%s114_s24 + $0x30] sm:$0xff]  ;;  %v140_v13 = vld [vmem:[%s114_s24 + $0x38] sm:$0xff] }
  0x3a   : > { %v146_v11 = vsub.f32 0.0, %v138_v8  ;;  %v149_v14 = vmul.f32 1.442695, %v141_v3  ;;  %v151_v15 = vmul.f32 1.442695, %v142_v4  ;;  %v147_v19 = vsub.f32 0.0, %v139_v12 }
  0x3b   : > { %v153_v16 = vmul.f32 1.442695, %v143_v5  ;;  %v155_v17 = vmul.f32 1.442695, %v144_v9  ;;  %v157_v18 = vmul.f32 1.442695, %v145_v10 }
  0x3c   : > { %337 = vpow2.f32 %v149_v14  ;;  %v148_v20 = vsub.f32 0.0, %v140_v13  ;;  %v159_v21 = vmul.f32 1.442695, %v146_v11  ;;  %v161_v22 = vmul.f32 1.442695, %v147_v19  ;;  %s191_s10 = scalar_lea.sflag [#allocation4], %s583_s21 }
  0x3d   : > { %339 = vpow2.f32 %v151_v15  ;;  %s399_s30 = scalar_lea.vmem %s601_s26, 1024  ;;  %p652_p10 = scmp.ne.s32.totalorder %s647_s18, 0 }
  0x3e   : > { %341 = vpow2.f32 %v153_v16  ;;  %v163_v23 = vmul.f32 1.442695, %v148_v20  ;;  %p400_p6 = scmp.ne.s32.totalorder %s601_s26, %s399_s30  ;;  %s468_s2 = smov [#allocation5]  }
  0x3f   : > { %343 = vpow2.f32 %v155_v17  ;;  %s403_s3 = sshll.u32 %s468_s2, 4  ;;  %s404_s3 = int_to_ptr.vmem [resolvable:$false] %s403_s3 }
  0x40   : > { %345 = vpow2.f32 %v157_v18  ;;  %p401_p11 = pnand %p400_p6, %p652_p10  ;;  %s405_s4 = scalar_lea.vmem %s404_s3, 2048 }
  0x41   : > { %347 = vpow2.f32 %v159_v21  ;;  %p406_p4 = scmp.lt.s32.totalorder %s601_s26, %s404_s3  ;;  %p407_p9 = scmp.lt.s32.totalorder %s405_s4, %s399_s30 }
  0x42   : > { %349 = vpow2.f32 %v161_v22  ;;  %p402_p12 = pneg %p401_p11 }
  0x43   : > { %351 = vpow2.f32 %v163_v23  ;;  %p408_p1 = por %p407_p9, %p406_p4 }
  0x45   : > { %p409_p3 = pnand %p408_p1, %p402_p12 }
  0x46   : > { %v338_v24 = vpop.eup %337 }
  0x47   : > { %v340_v25 = vpop.eup %339  ;;  %v165_v26 = vadd.f32 1.0, %v338_v24 }
  0x48   : > { %v342_v27 = vpop.eup %341  ;;  %v166_v28 = vadd.f32 1.0, %v340_v25 }
  0x49   : > { %v344_v29 = vpop.eup %343  ;;  %353 = vrcp.f32 %v165_v26  ;;  %v167_v30 = vadd.f32 1.0, %v342_v27 }
  0x4a   : > { %v346_v31 = vpop.eup %345  ;;  %355 = vrcp.f32 %v166_v28  ;;  %v168_v32 = vadd.f32 1.0, %v344_v29 }
  0x4b   : > { %v348_v33 = vpop.eup %347  ;;  %357 = vrcp.f32 %v167_v30  ;;  %v169_v34 = vadd.f32 1.0, %v346_v31 }
  0x4c   : > { %v350_v35 = vpop.eup %349  ;;  %359 = vrcp.f32 %v168_v32  ;;  %v170_v36 = vadd.f32 1.0, %v348_v33 }
  0x4d   : > { %v352_v37 = vpop.eup %351  ;;  %361 = vrcp.f32 %v169_v34  ;;  %v171_v38 = vadd.f32 1.0, %v350_v35 }
  0x4e   : > { %363 = vrcp.f32 %v170_v36  ;;  %v172_v39 = vadd.f32 1.0, %v352_v37 }
  0x4f   : > { %365 = vrcp.f32 %v171_v38 }
  0x50   : > { %367 = vrcp.f32 %v172_v39 }
  0x53   : > { %v354_v40 = vpop.eup %353 }
  0x54   : > { %v356_v41 = vpop.eup %355  ;;  %181 = vst [vmem:[%s132_s17] sm:$0xff] %v354_v40 }
  0x55   : > { %v358_v42 = vpop.eup %357  ;;  %182 = vst [vmem:[%s132_s17 + $0x8] sm:$0xff] %v356_v41 }
  0x56   : > { %v360_v43 = vpop.eup %359  ;;  %183 = vst [vmem:[%s132_s17 + $0x10] sm:$0xff] %v358_v42 }
  0x57   : > { %v362_v44 = vpop.eup %361  ;;  %184 = vst [vmem:[%s132_s17 + $0x18] sm:$0xff] %v360_v43 }
  0x58   : > { %v364_v45 = vpop.eup %363  ;;  %185 = vst [vmem:[%s132_s17 + $0x20] sm:$0xff] %v362_v44 }
  0x59   : > { %v366_v46 = vpop.eup %365  ;;  %186 = vst [vmem:[%s132_s17 + $0x28] sm:$0xff] %v364_v45 }
  0x5a   : > { %v368_v47 = vpop.eup %367  ;;  %187 = vst [vmem:[%s132_s17 + $0x30] sm:$0xff] %v366_v46 }
  0x5b   : > { %189 = vst.msk [vmem:[%s132_s17 + $0x38] sm:$0xff] %vm188_vm0, %v368_v47 }
  0x5c   : > { %412 = shalt.err (!%p409_p3)
}
  0x5d   : > { %s413_s5 = scalar_lea.hbm %s599_s29, 1024  ;;  %s417_s14 = scalar_lea.hbm %s643_s1, 4096 }
  0x5e   : > { %p414_p5 = scmp.ne.s32.totalorder %s599_s29, %s413_s5  ;;  %p418_p13 = scmp.lt.u32.totalorder %s599_s29, %s643_s1 }
  0x5f   : > { %p419_p0 = scmp.lt.u32.totalorder %s417_s14, %s413_s5  ;;  %p421_p6 = scmp.lt.u32.totalorder %s413_s5, %s599_s29 }
  0x60   : > { %p415_p7 = pnand %p414_p5, %p652_p10 }
  0x61   : > { %p420_p2 = por %p419_p0, %p418_p13 }
  0x62   : > { %p416_p8 = pneg %p415_p7 }
  0x63   : > { %p422_p11 = por %p421_p6, %p420_p2 }
  0x65   : > { %p423_p12 = pnand %p422_p11, %p416_p8 }
  0x67   : > { %426 = shalt.err (!%p423_p12)
}
  0x68   : > { %293 = dma.vmem_to_hbm [thread:$0]  (%p652_p10), %s601_s26, 1024, %s599_s29, %s191_s10  }
  0x69 PF: > { %p304_p4 = scmp.ge.s32.totalorder %s465_s9, 2  ;;  %s217_s21 = sand.u32 1, %s453_s6  }
  0x6a   : > { %p653_p9 = scmp.ne.s32.totalorder %s648_s19, 0  ;;  %s218_s22 = scalar_lea.sflag [#allocation4], %s217_s21 }
  0x6c   : > { %p300_p1 = pnand %p304_p4, %p653_p9 }
  0x6e   : > { %448 = dma.done.wait (!%p300_p1), %s218_s22, 1024  }
  0x6f   : > { %450 = vsyncadd (!%p300_p1), %s218_s22, 4294966272  ;;  %p14_p3 = scmp.ge.s32.totalorder %s504_s12, 6   ;;  %s654_s6 = smov %s457_s7 }
  0x70   : > { %s655_s7 = smov %s461_s8  ;;  %s656_s8 = smov %s516_s15 }
  0x71   : > { %s657_s9 = smov %s504_s12  ;;  %16 = sbr.rel (!%p14_p3) target bundleno = 5 (0x5), region = 69 }
  0x78   :  { %223 = vsyncpa [#allocation3], 1 }
  0x79   :  { %225 = vsyncpa [#allocation3 + $0x1], 1 }
  0x7a   :  { %226 = vsyncpa [#allocation4], 1 }
  0x7b   :  { %228 = vsyncpa [#allocation4 + $0x1], 1 }

</bundles_post_ra>
